<compile_context>
chip_gen: v5e
topology: v5e:2x2
jax: 0.10.0
libtpu: 0.0.40
codegen_flags: <defaults>
</compile_context>

<pallas_src>
import functools

import jax
import jax.numpy as jnp
from jax.experimental import pallas as pl
from jax.experimental.pallas import tpu as pltpu


def _round_up(x: int, m: int) -> int:
    return ((x + m - 1) // m) * m


def _cdiv(a: int, b: int) -> int:
    return (a + b - 1) // b


# ---------------------------------------------------------------------------
# Kernel
# ---------------------------------------------------------------------------
def _fused_mlp_kernel(x_ref, *refs):
    """refs = (w0, b0, w1, b1, ..., o_ref).

    Runs the whole Linear chain with the activation held in VMEM / vregs;
    intermediate activations never round-trip to HBM.  Weights may be stored
    in a narrower MXU dtype (e.g. bf16); accumulation and bias add stay f32.
    """
    *wb_refs, o_ref = refs
    h = x_ref[...]
    for i in range(0, len(wb_refs), 2):
        w = wb_refs[i][...]
        b = wb_refs[i + 1][...]
        lhs = h if h.dtype == w.dtype else h.astype(w.dtype)
        h = jnp.dot(lhs, w, preferred_element_type=jnp.float32)  # MXU, f32 acc
        h = h + b.astype(jnp.float32)                             # VPU, f32
    o_ref[...] = h.astype(o_ref.dtype)


# ---------------------------------------------------------------------------
# Tile selection (v7x dual-TensorCore aware + VMEM budget guard)
# ---------------------------------------------------------------------------
_VMEM_BUDGET_BYTES = 24 * 1024 * 1024   # stay under the 32 MiB scoped default
_VMEM_LIMIT_BYTES = 32 * 1024 * 1024    # << physical VMEM: 128 MiB (v5e/v6e), 64 MiB (v7x)


def _pick_tile_b(batch: int, k0: int, n_out: int, params) -> int:
    b8 = _round_up(batch, 8)
    if b8 <= 256:
        tile_b = b8                            # one tile, whole problem VMEM-resident
    elif b8 <= 2048:
        # >= 2 "parallel" tiles so v7x's two TensorCores both get work.
        tile_b = _round_up(_cdiv(b8, 2), 8)
    else:
        tile_b = 1024                          # large-batch / v6e roofline sweet spot

    weight_bytes = 2 * sum(w.size * w.dtype.itemsize + b.size * b.dtype.itemsize
                           for w, b in params)

    def vmem_bytes(t):
        # double-buffered input + output batch tiles, plus (double-buffered) weights
        return 2 * t * k0 * 4 + 2 * t * n_out * 4 + weight_bytes

    while tile_b > 8 and vmem_bytes(tile_b) > _VMEM_BUDGET_BYTES:
        tile_b = max(8, _round_up(tile_b // 2, 8))
    return tile_b


# ---------------------------------------------------------------------------
# pallas_call wrapper
# ---------------------------------------------------------------------------
def fused_mlp(x, params):
    """x: (batch, k0) f32.  params: list of (W (k,n), b (1,n)) JAX arrays."""
    batch, k0 = x.shape
    n_out = params[-1][0].shape[1]

    flat = []
    for w, b in params:
        flat.extend((w, b))

    out_shape = jax.ShapeDtypeStruct((batch, n_out), x.dtype)

    tile_b = _pick_tile_b(batch, k0, n_out, params)
    n_tiles = _cdiv(batch, tile_b)

    if n_tiles == 1:
        # Small batch: no grid, whole arrays VMEM-resident, single invocation.
        return pl.pallas_call(_fused_mlp_kernel, out_shape=out_shape)(x, *flat)

    # Tile the batch axis; the last tile may be ragged (padded load, the
    # out-of-bounds rows of the store are dropped by Pallas).  Each output row
    # depends only on its own input row, so raggedness cannot corrupt results.
    in_specs = [pl.BlockSpec((tile_b, k0), lambda i: (i, 0))]
    for w, b in params:
        in_specs.append(pl.BlockSpec(w.shape, lambda i: (0, 0)))
        in_specs.append(pl.BlockSpec(b.shape, lambda i: (0, 0)))

    return pl.pallas_call(
        _fused_mlp_kernel,
        out_shape=out_shape,
        grid_spec=pl.GridSpec(
            grid=(n_tiles,),
            in_specs=in_specs,
            out_specs=pl.BlockSpec((tile_b, n_out), lambda i: (i, 0)),
        ),
        compiler_params=pltpu.CompilerParams(
            dimension_semantics=("parallel",),      # shards tiles across v7x's 2 TCs
            vmem_limit_bytes=_VMEM_LIMIT_BYTES,
        ),
    )(x, *flat)


# ---------------------------------------------------------------------------
# Parameters
# ---------------------------------------------------------------------------
def init_toy_mlp_params(key, img_width, img_height, hidden_dim, num_layers):
    """Deterministic init matching torch.nn.Linear default U(-1/sqrt(fan_in), +)."""
    input_dim = img_width * img_height
    dims = [(input_dim if i == 0 else hidden_dim, hidden_dim)
            for i in range(num_layers)]
    dims.append((hidden_dim, input_dim))  # final projection back to input_dim

    params = []
    for fan_in, fan_out in dims:
        key, kw, kb = jax.random.split(key, 3)
        bound = 1.0 / (fan_in ** 0.5)
        # Store W as (in_features, out_features) so the kernel computes x @ W.
        w = jax.random.uniform(kw, (fan_in, fan_out), jnp.float32, -bound, bound)
        b = jax.random.uniform(kb, (1, fan_out), jnp.float32, -bound, bound)
        params.append((w, b))
    return params


def prepare_params(params, *, precompose=True, mxu_dtype=None):
    """One-time param prep.

    precompose: collapse the activation-free Linear chain into a single
      (W_eff, b_eff) -> one matmul + bias per batch tile (legal because the
      module has no nonlinearities).
    mxu_dtype: optionally pre-cast weights once (e.g. jnp.bfloat16) for the
      v6e/v7x MXU; accumulation and bias stay f32 in the kernel.
    """
    if precompose:
        w_eff, b_eff = params[0]
        for w, b in params[1:]:
            b_eff = b_eff @ w + b
            w_eff = w_eff @ w
        params = [(w_eff, b_eff)]
    if mxu_dtype is not None:
        params = [(w.astype(mxu_dtype), b) for w, b in params]
    return params


# ---------------------------------------------------------------------------
# Forward (matches ToyMLP.forward: view -> Linear chain -> view)
# ---------------------------------------------------------------------------
@functools.partial(jax.jit, static_argnames=("img_width", "img_height"))
def toy_mlp_forward(x_nchw, prepared_params, *, img_width, img_height):
    """x_nchw: (B, C, H, W) with C*H*W == img_width*img_height (as in the module)."""
    input_dim = img_width * img_height
    x = x_nchw.reshape(-1, input_dim)            # x.view(-1, input_dim)
    out = fused_mlp(x, prepared_params)          # (batch, input_dim), no pad/slice copies
    return out.reshape(-1, 1, img_height, img_width)


if __name__ == "__main__":
    img_width, img_height = 16, 16
    hidden_dim = 32
    num_layers = 2

    key = jax.random.PRNGKey(0)
    key, kx = jax.random.split(key)

    params = init_toy_mlp_params(key, img_width, img_height, hidden_dim, num_layers)
    # f32 weights by default to preserve 1e-4 agreement; pass
    # mxu_dtype=jnp.bfloat16 here for max MXU throughput on v6e/v7x.
    prepared = prepare_params(params, precompose=True, mxu_dtype=None)

    def reference(x_img):
        h = x_img.reshape(-1, img_width * img_height)
        for w, b in params:                      # UNprepared, per-layer f32 chain
            h = h @ w + b
        return h.reshape(-1, 1, img_height, img_width)

    # Small batch: single-tile (no-grid) path.
    x_small = jax.random.normal(kx, (2, 1, img_height, img_width), jnp.float32)
    out_small = jax.block_until_ready(
        toy_mlp_forward(x_small, prepared, img_width=img_width, img_height=img_height))
    ref_small = reference(x_small)
    assert out_small.shape == (2, 1, img_height, img_width)
    assert jnp.allclose(out_small, ref_small, atol=1e-4, rtol=1e-4), float(
        jnp.max(jnp.abs(out_small - ref_small)))

    # Larger batch: exercises the tiled "parallel" path with a ragged tail tile.
    key, kx2 = jax.random.split(key)
    x_big = jax.random.normal(kx2, (300, 1, img_height, img_width), jnp.float32)
    out_big = jax.block_until_ready(
        toy_mlp_forward(x_big, prepared, img_width=img_width, img_height=img_height))
    ref_big = reference(x_big)
    assert out_big.shape == (300, 1, img_height, img_width)
    assert jnp.allclose(out_big, ref_big, atol=1e-4, rtol=1e-4), float(
        jnp.max(jnp.abs(out_big - ref_big)))

    print("KERNEL_OK")
</pallas_src>

<mosaic_0001>
module attributes {stable_mosaic.version = 11 : i64} {
  func.func @_fused_mlp_kernel(%arg0: memref<2x256xf32, #tpu.memory_space<vmem>>, %arg1: memref<256x256xf32, #tpu.memory_space<vmem>>, %arg2: memref<1x256xf32, #tpu.memory_space<vmem>>, %arg3: memref<2x256xf32, #tpu.memory_space<vmem>>) attributes {dimension_semantics = [], scalar_prefetch = 0 : i64, scratch_operands = 0 : i64, tpu.core_type = #tpu.core_type<tc>} {
    %c0 = arith.constant 0 : index
    %c0_0 = arith.constant 0 : index
    %0 = vector.load %arg0[%c0, %c0_0] : memref<2x256xf32, #tpu.memory_space<vmem>>, vector<2x256xf32>
    %c0_1 = arith.constant 0 : index
    %c0_2 = arith.constant 0 : index
    %1 = vector.load %arg1[%c0_1, %c0_2] : memref<256x256xf32, #tpu.memory_space<vmem>>, vector<256x256xf32>
    %c0_3 = arith.constant 0 : index
    %c0_4 = arith.constant 0 : index
    %2 = vector.load %arg2[%c0_3, %c0_4] : memref<1x256xf32, #tpu.memory_space<vmem>>, vector<1x256xf32>
    %cst = arith.constant dense<0.000000e+00> : vector<2x256xf32>
    %3 = tpu.matmul %0, %1, %cst {dimension_numbers = #tpu.dot_dimension_numbers<[1], [0], [0], [1], [0, 0, 1, 1], [], []>} : vector<2x256xf32>, vector<256x256xf32>, vector<2x256xf32> -> vector<2x256xf32>
    %4 = vector.broadcast %2 : vector<1x256xf32> to vector<2x256xf32>
    %5 = arith.addf %3, %4 : vector<2x256xf32>
    %c0_5 = arith.constant 0 : index
    %c0_6 = arith.constant 0 : index
    %6 = vector.load %arg3[%c0_5, %c0_6] : memref<2x256xf32, #tpu.memory_space<vmem>>, vector<2x256xf32>
    tpu.vector_store %arg3[%c0_5, %c0_6], %5 {strides = array<i32>} : memref<2x256xf32, #tpu.memory_space<vmem>>, vector<2x256xf32>,
    return
  }
}

</mosaic_0001>

<bundles_post_ra>
// kernel: toy_mlp_forward.1
= control target key start
LH: loop header
LB: loop body
LE: loop exit
PB: predicated region body
PF: predicated region fallthrough
CT: control target
= control target key end

     0   :  { %8 = vsyncpa [#allocation3], 0  ;;  %s228_s15 = smov [#allocation2]   ;;  %s229_s17 = smov 256   ;;  %s263_s0 = inlined_call_operand.vmem [shape: f32[2,256], index: 0, kind: input, shape index: {}]   ;;  %s264_s1 = inlined_call_operand.hbm [shape: f32[256,256], index: 1, kind: input, shape index: {}]   ;;  %s265_s2 = inlined_call_operand.vmem [shape: f32[1,256], index: 2, kind: input, shape index: {}]   ;;  %s266_s3 = inlined_call_operand.vmem [shape: f32[2,256], index: 3, kind: output, shape index: {}]  }
   0x1   :  { %s15_s14 = sshll.u32 %s264_s1, 4  ;;  %s17_s16 = sshll.u32 %s228_s15, 4  ;;  %s16_s14 = int_to_ptr.hbm [resolvable:$true] %s15_s14  ;;  %s18_s16 = int_to_ptr.vmem [resolvable:$true] %s17_s16 }
   0x2   :  { %s230_s18 = smov 16  }
   0x3   :  { %23 = dma.hbm_to_vmem [thread:$0]  %s16_s14, 8192, %s18_s16, [#allocation3], %s229_s17, %s229_s17, %s230_s18  }
   0x4   :  { %226 = dma.done.wait [#allocation3], 8192  }
   0x5   :  { %227 = vsyncadd [#allocation3], 4294959104  ;;  %v62_v0 = vld [vmem:[#allocation2 + $0xf8] sm:$0xff]  ;;  %v60_v1 = vld [vmem:[#allocation2 + $0xe8] sm:$0xff]  ;;  %vm190_vm0 = vcmask 1041408  }
   0x6   :  { %v94_v2 = vld [vmem:[#allocation2 + $0x1f8] sm:$0xff]  ;;  %147 = vmatpush.msra.mxu2 %v62_v0  ;;  %v92_v3 = vld [vmem:[#allocation2 + $0x1e8] sm:$0xff]  ;;  %v61_v6 = vld [vmem:[#allocation2 + $0xf0] sm:$0xff] }
   0x7   :  { %167 = vmatpush.msra.mxu3 %v94_v2  ;;  %v58_v4 = vld [vmem:[#allocation2 + $0xd8] sm:$0xff]  ;;  %v59_v7 = vld [vmem:[#allocation2 + $0xe0] sm:$0xff]  ;;  %v93_v8 = vld [vmem:[#allocation2 + $0x1f0] sm:$0xff]  ;;  %107 = vmatpush.msra.mxu0 %v61_v6 }
   0x8   :  { %v90_v5 = vld [vmem:[#allocation2 + $0x1d8] sm:$0xff]  ;;  %148 = vmatpush.msra.mxu2 %v60_v1  ;;  %v56_v9 = vld [vmem:[#allocation2 + $0xc8] sm:$0xff]  ;;  %127 = vmatpush.msra.mxu1 %v93_v8  ;;  %v57_v11 = vld [vmem:[#allocation2 + $0xd0] sm:$0xff] }
   0x9   :  { %168 = vmatpush.msra.mxu3 %v92_v3  ;;  %v88_v10 = vld [vmem:[#allocation2 + $0x1c8] sm:$0xff]  ;;  %v91_v12 = vld [vmem:[#allocation2 + $0x1e0] sm:$0xff]  ;;  %v54_v13 = vld [vmem:[#allocation2 + $0xb8] sm:$0xff]  ;;  %108 = vmatpush.msra.mxu0 %v59_v7 }
   0xa   :  { %149 = vmatpush.msra.mxu2 %v58_v4  ;;  %v86_v14 = vld [vmem:[#allocation2 + $0x1b8] sm:$0xff]  ;;  %128 = vmatpush.msra.mxu1 %v91_v12  ;;  %v89_v15 = vld [vmem:[#allocation2 + $0x1d0] sm:$0xff]  ;;  %v55_v16 = vld [vmem:[#allocation2 + $0xc0] sm:$0xff] }
   0xb   :  { %169 = vmatpush.msra.mxu3 %v90_v5  ;;  %v87_v17 = vld [vmem:[#allocation2 + $0x1c0] sm:$0xff]  ;;  %v52_v18 = vld [vmem:[#allocation2 + $0xa8] sm:$0xff]  ;;  %109 = vmatpush.msra.mxu0 %v57_v11  ;;  %v53_v20 = vld [vmem:[#allocation2 + $0xb0] sm:$0xff] }
   0xc   :  { %150 = vmatpush.msra.mxu2 %v56_v9  ;;  %v84_v19 = vld [vmem:[#allocation2 + $0x1a8] sm:$0xff]  ;;  %129 = vmatpush.msra.mxu1 %v89_v15  ;;  %v85_v21 = vld [vmem:[#allocation2 + $0x1b0] sm:$0xff]  ;;  %v50_v22 = vld [vmem:[#allocation2 + $0x98] sm:$0xff] }
   0xd   :  { %170 = vmatpush.msra.mxu3 %v88_v10  ;;  %110 = vmatpush.msra.mxu0 %v55_v16  ;;  %v82_v23 = vld [vmem:[#allocation2 + $0x198] sm:$0xff]  ;;  %v51_v24 = vld [vmem:[#allocation2 + $0xa0] sm:$0xff]  ;;  %v48_v26 = vld [vmem:[#allocation2 + $0x88] sm:$0xff] }
   0xe   :  { %151 = vmatpush.msra.mxu2 %v54_v13  ;;  %130 = vmatpush.msra.mxu1 %v87_v17  ;;  %v83_v25 = vld [vmem:[#allocation2 + $0x1a0] sm:$0xff]  ;;  %v80_v27 = vld [vmem:[#allocation2 + $0x188] sm:$0xff]  ;;  %v49_v28 = vld [vmem:[#allocation2 + $0x90] sm:$0xff] }
   0xf   :  { %171 = vmatpush.msra.mxu3 %v86_v14  ;;  %111 = vmatpush.msra.mxu0 %v53_v20  ;;  %v81_v29 = vld [vmem:[#allocation2 + $0x190] sm:$0xff]  ;;  %v46_v30 = vld [vmem:[#allocation2 + $0x78] sm:$0xff]  ;;  %v47_v32 = vld [vmem:[#allocation2 + $0x80] sm:$0xff] }
  0x10   :  { %152 = vmatpush.msra.mxu2 %v52_v18  ;;  %131 = vmatpush.msra.mxu1 %v85_v21  ;;  %v78_v31 = vld [vmem:[#allocation2 + $0x178] sm:$0xff]  ;;  %v79_v33 = vld [vmem:[#allocation2 + $0x180] sm:$0xff]  ;;  %v44_v34 = vld [vmem:[#allocation2 + $0x68] sm:$0xff] }
  0x11   :  { %172 = vmatpush.msra.mxu3 %v84_v19  ;;  %112 = vmatpush.msra.mxu0 %v51_v24  ;;  %v76_v35 = vld [vmem:[#allocation2 + $0x168] sm:$0xff]  ;;  %v45_v36 = vld [vmem:[#allocation2 + $0x70] sm:$0xff]  ;;  %v42_v38 = vld [vmem:[#allocation2 + $0x58] sm:$0xff] }
  0x12   :  { %153 = vmatpush.msra.mxu2 %v50_v22  ;;  %132 = vmatpush.msra.mxu1 %v83_v25  ;;  %v77_v37 = vld [vmem:[#allocation2 + $0x170] sm:$0xff]  ;;  %v74_v39 = vld [vmem:[#allocation2 + $0x158] sm:$0xff]  ;;  %v43_v41 = vld [vmem:[#allocation2 + $0x60] sm:$0xff] }
  0x13   :  { %173 = vmatpush.msra.mxu3 %v82_v23  ;;  %113 = vmatpush.msra.mxu0 %v49_v28  ;;  %v30_v40 = vld [vmem:[%s263_s0] sm:$0xf]  ;;  %v75_v42 = vld [vmem:[#allocation2 + $0x160] sm:$0xff]  ;;  %v40_v43 = vld [vmem:[#allocation2 + $0x48] sm:$0xff] }
  0x14   :  { %154 = vmatpush.msra.mxu2 %v48_v26  ;;  %133 = vmatpush.msra.mxu1 %v81_v29  ;;  %102 = vst [vmem:[#allocation1] ss:$4 sm:$0xff] %v30_v40  ;;  %v72_v44 = vld [vmem:[#allocation2 + $0x148] sm:$0xff]  ;;  %v41_v45 = vld [vmem:[#allocation2 + $0x50] sm:$0xff]  ;;  %v38_v47 = vld [vmem:[#allocation2 + $0x38] sm:$0xff] }
  0x15   :  { %174 = vmatpush.msra.mxu3 %v80_v27  ;;  %114 = vmatpush.msra.mxu0 %v47_v32  ;;  %v73_v46 = vld [vmem:[#allocation2 + $0x150] sm:$0xff]  ;;  %v70_v48 = vld [vmem:[#allocation2 + $0x138] sm:$0xff]  ;;  %v39_v49 = vld [vmem:[#allocation2 + $0x40] sm:$0xff] }
  0x16   :  { %155 = vmatpush.msra.mxu2 %v46_v30  ;;  %134 = vmatpush.msra.mxu1 %v79_v33  ;;  %v71_v50 = vld [vmem:[#allocation2 + $0x140] sm:$0xff]  ;;  %v36_v51 = vld [vmem:[#allocation2 + $0x28] sm:$0xff]  ;;  %v37_v53 = vld [vmem:[#allocation2 + $0x30] sm:$0xff] }
  0x17   :  { %175 = vmatpush.msra.mxu3 %v78_v31  ;;  %115 = vmatpush.msra.mxu0 %v45_v36  ;;  %v68_v52 = vld [vmem:[#allocation2 + $0x128] sm:$0xff]  ;;  %v69_v54 = vld [vmem:[#allocation2 + $0x130] sm:$0xff]  ;;  %v34_v55 = vld [vmem:[#allocation2 + $0x18] sm:$0xff] }
  0x18   :  { %156 = vmatpush.msra.mxu2 %v44_v34  ;;  %135 = vmatpush.msra.mxu1 %v77_v37  ;;  %v66_v56 = vld [vmem:[#allocation2 + $0x118] sm:$0xff]  ;;  %v35_v57 = vld [vmem:[#allocation2 + $0x20] sm:$0xff]  ;;  %v32_v59 = vld [vmem:[#allocation2 + $0x8] sm:$0xff] }
  0x19   :  { %176 = vmatpush.msra.mxu3 %v76_v35  ;;  %116 = vmatpush.msra.mxu0 %v43_v41  ;;  %v67_v58 = vld [vmem:[#allocation2 + $0x120] sm:$0xff]  ;;  %v64_v60 = vld [vmem:[#allocation2 + $0x108] sm:$0xff]  ;;  %v33_v63 = vld [vmem:[#allocation2 + $0x10] sm:$0xff] }
  0x1a   :  { %157 = vmatpush.msra.mxu2 %v42_v38  ;;  %136 = vmatpush.msra.mxu1 %v75_v42  ;;  %v65_v0 = vld [vmem:[#allocation2 + $0x110] sm:$0xff]  ;;  %v31_v1 = vld [vmem:[#allocation2] sm:$0xff]  ;;  %v95_v3 = vld [vmem:[%s265_s2] sm:$0x3] }
  0x1b   :  { %177 = vmatpush.msra.mxu3 %v74_v39  ;;  %117 = vmatpush.msra.mxu0 %v41_v45  ;;  %v103_v61 = vld.sshfl [vmem:[#allocation1] sm:$0xff pattern:$0x73625140]  ;;  %v104_v62 = vld.sshfl [vmem:[#allocation1 + $0x8] sm:$0xff pattern:$0x73625140] }
  0x1c   :  { %158 = vmatpush.msra.mxu2 %v40_v43  ;;  %137 = vmatpush.msra.mxu1 %v73_v46  ;;  %v63_v2 = vld [vmem:[#allocation2 + $0x100] sm:$0xff]  ;;  %v97_v4 = vperm.slane %v95_v3, 0  ;;  %v98_v5 = vperm.slane %v95_v3, 1 }
  0x1d   :  { %178 = vmatpush.msra.mxu3 %v72_v44  ;;  %118 = vmatpush.msra.mxu0 %v39_v49 }
  0x1e   :  { %159 = vmatpush.msra.mxu2 %v38_v47  ;;  %138 = vmatpush.msra.mxu1 %v71_v50 }
  0x1f   :  { %179 = vmatpush.msra.mxu3 %v70_v48  ;;  %119 = vmatpush.msra.mxu0 %v37_v53 }
  0x20   :  { %160 = vmatpush.msra.mxu2 %v36_v51  ;;  %139 = vmatpush.msra.mxu1 %v69_v54 }
  0x21   :  { %180 = vmatpush.msra.mxu3 %v68_v52  ;;  %120 = vmatpush.msra.mxu0 %v35_v57 }
  0x22   :  { %161 = vmatpush.msra.mxu2 %v34_v55  ;;  %140 = vmatpush.msra.mxu1 %v67_v58 }
  0x23   :  { %181 = vmatpush.msra.mxu3 %v66_v56  ;;  %121 = vmatpush.msra.mxu0 %v33_v63 }
  0x24   :  { %162 = vmatpush.msra.mxu2 %v32_v59  ;;  %141 = vmatpush.msra.mxu1 %v65_v0 }
  0x25   :  { %182 = vmatpush.msra.mxu3 %v64_v60  ;;  %163 = vmatmul.f32.vlgmr.msra.gmra.mxu2 %v103_v61 }
  0x26   :  { %183 = vmatmul.f32.vlgmr.msra.gmra.mxu3 %v104_v62  ;;  %122 = vmatpush.msra.mxu0 %v31_v1 }
  0x27   :  { %142 = vmatpush.msra.mxu1 %v63_v2  ;;  %123 = vmatmul.f32.vlgmr.msra.gmra.mxu0 %v103_v61 }
  0x28   :  { %143 = vmatmul.f32.vlgmr.msra.gmra.mxu1 %v104_v62 }
  0xa4   :  { %v124_v6 = vpop.f32.mrf.mxu0 }
  0xa5   :  { %v125_v7 = vadd.f32 %v124_v6, %v97_v4  ;;  %v144_v8 = vpop.f32.mrf.mxu1 }
  0xa7   :  { %v145_v13 = vadd.f32 %v144_v8, %v125_v7 }
  0xa8   :  { %v164_v9 = vpop.f32.mrf.mxu2 }
  0xa9   :  { %v184_v10 = vpop.f32.mrf.mxu3  ;;  %v165_v11 = vadd.f32 %v164_v9, %v98_v5 }
  0xab   :  { %v185_v12 = vadd.f32 %v184_v10, %v165_v11 }
  0xad   :  { %v189_v14 = vrot.slane %v185_v12, 6 }
  0xaf   :  { %v191_v15 = vsel %vm190_vm0, %v145_v13, %v189_v14 }
  0xb0   :  { %193 = vst [vmem:[%s266_s3] sm:$0xf] %v191_v15 }
  0xb1   :  { %198 = vsyncpa [#allocation3], 1 }

</bundles_post_ra>
